<compile_context>
chip_gen: v7x
topology: tpu7x:2x2x1
jax: 0.10.0
libtpu: 0.0.40
codegen_flags: <defaults>
</compile_context>

<pallas_src>
import functools

import numpy as np
import jax
import jax.numpy as jnp
from jax import lax
from jax.experimental import pallas as pl
from jax.experimental.pallas import tpu as pltpu

EPS = 1e-5


# --------------------------------------------------------------------------------------
# Pallas kernel: one row-block of the variable-selection attention + FFN + LayerNorm
# --------------------------------------------------------------------------------------
def vsn_kernel(xin_ref,
               w_big_ref, b_big_ref, m_sum_ref, m_bcast_ref, head_avg_ref,
               w_af_ref, b_af_ref, w2_ref, b2_ref, g_ref, be_ref,
               out_ref, wts_ref, *, hidden, n_heads, n_vars, sect, eps):
    f32 = jnp.float32
    H = hidden
    S = sect                    # padded per-section width: round_up((n_vars+1)*H, 128)
    NT = n_vars + 1             # tokens = cls + variables

    # ---- single fused projection: [K_all | V_all | Q_rep] for all tokens ----
    xin = xin_ref[...]                                                        # (bb, f_in)
    proj = jnp.dot(xin, w_big_ref[...], preferred_element_type=f32) + b_big_ref[...]
    k_all = proj[:, :S]                    # (bb, S)  [k_cls | k_var1..V | 0 pad]
    v_all = proj[:, S:2 * S]               # (bb, S)  [v_cls | v_var1..V | 0 pad]
    q_rep = proj[:, 2 * S:]                # (bb, S)  scaled q replicated per token slot

    # ---- attention scores, one indicator matmul for all (token, head) pairs ----
    qk = q_rep * k_all                                                        # (bb, S)
    s_all = jnp.dot(qk, m_sum_ref[...], preferred_element_type=f32)           # (bb, NT*heads)

    # per-(row, head) max over tokens (token-major score columns), stable softmax
    parts = [s_all[:, t * n_heads:(t + 1) * n_heads] for t in range(NT)]
    mmax = parts[0]
    for t in range(1, NT):
        mmax = jnp.maximum(mmax, parts[t])
    e_all = jnp.exp(s_all - jnp.concatenate([mmax] * NT, axis=-1))
    denom = e_all[:, :n_heads]
    for t in range(1, NT):
        denom = denom + e_all[:, t * n_heads:(t + 1) * n_heads]
    inv = pl.reciprocal(denom, approx=False)
    p_all = e_all * jnp.concatenate([inv] * NT, axis=-1)                      # (bb, NT*heads)

    # ---- weighted value sum, W_o and FF-Linear1 folded into one matmul ----
    pb = jnp.dot(p_all, m_bcast_ref[...], preferred_element_type=f32)         # (bb, S)
    ah = jnp.dot(pb * v_all, w_af_ref[...], preferred_element_type=f32) + b_af_ref[...]
    attn = ah[:, :H]                       # attention output (after out_proj)
    h1 = jnp.maximum(ah[:, H:], 0.0)       # ReLU(FF linear 1)
    ff = jnp.dot(h1, w2_ref[...], preferred_element_type=f32) + b2_ref[...]

    # residual + LayerNorm
    y = attn + ff
    mu = jnp.mean(y, axis=-1, keepdims=True)
    var = jnp.mean((y - mu) ** 2, axis=-1, keepdims=True)
    out_ref[...] = (y - mu) * lax.rsqrt(var + eps) * g_ref[...] + be_ref[...]

    # variable-selection weights: attention probs averaged over heads, CLS column excluded
    wts_ref[...] = jnp.dot(p_all, head_avg_ref[...], preferred_element_type=f32)


# --------------------------------------------------------------------------------------
# Blocking: large row-blocks, even grid (>=2 steps) so both v7x TCs get work
# --------------------------------------------------------------------------------------
def _choose_blocking(n_rows, cap=1024):
    """Returns (block_rows, num_blocks); rows are zero-padded up to block_rows*num_blocks."""
    half = -(-n_rows // 2)                       # ceil(n/2): aim for >= 2 grid steps
    bb = min(cap, max(8, -(-half // 8) * 8))     # multiple of 8 sublanes, capped
    nblk = -(-n_rows // bb)
    if nblk > 1 and nblk % 2:
        nblk += 1                                # even #blocks -> balanced v7x megacore split
    return bb, nblk


# --------------------------------------------------------------------------------------
# Wrapper: host-side weight fusion + pallas_call
# --------------------------------------------------------------------------------------
def transformer_vsn_forward(x, params, input_sizes, hidden, n_heads, context=None):
    f32 = jnp.float32
    names = list(input_sizes)
    V = len(names)
    H = hidden
    heads = n_heads
    assert H % heads == 0
    dh = H // heads
    NT = V + 1
    S = -(-(NT * H) // 128) * 128                      # token-section width, 128-lane aligned

    # ---- flatten per-variable inputs to one row per (batch, time) ----
    xs = []
    for n in names:
        v = x[n].astype(f32)
        if v.ndim == 2:
            v = v[:, None, :]
        xs.append(v)
    B, T = xs[0].shape[0], xs[0].shape[1]
    R = B * T
    x_cat = jnp.concatenate(xs, axis=-1).reshape(R, -1)
    f_sum = x_cat.shape[-1]

    # ---- context handling: stream RAW context lanes, fold its projection into the weight ----
    cls_vec = params["cls"].reshape(H).astype(f32)
    if context is not None:
        ctx = context.astype(f32)
        if ctx.ndim == 2:
            ctx = jnp.broadcast_to(ctx[:, None, :], (B, T, ctx.shape[-1]))
        ctx = ctx.reshape(R, -1)
        C = ctx.shape[-1]
        xin = jnp.concatenate([x_cat, ctx], axis=-1)
        cls_eff = cls_vec + params["ctx_b"].astype(f32)
        ctx_w_t = params["ctx_w"].astype(f32).T        # (C, H)
    else:
        C = 0
        xin = x_cat
        cls_eff = cls_vec
        ctx_w_t = None

    f_raw = xin.shape[-1]
    pad_f = (-f_raw) % 8
    if pad_f:
        xin = jnp.pad(xin, ((0, 0), (0, pad_f)))
    f_in = f_raw + pad_f

    # ---- host-side weight fusion (all transposes / folds once, outside the kernel) ----
    in_w, in_b = params["in_w"].astype(f32), params["in_b"].astype(f32)
    wq, bq = in_w[:H], in_b[:H]
    wk, bk = in_w[H:2 * H], in_b[H:2 * H]
    wv, bv = in_w[2 * H:], in_b[2 * H:]
    scale = 1.0 / float(np.sqrt(dh))
    wq_t = wq.T * scale                                # fold 1/sqrt(dh) into Q weight + bias
    bq_s = bq * scale
    wk_t, wv_t = wk.T, wv.T

    w_big = jnp.zeros((f_in, 3 * S), f32)
    b_big = jnp.zeros((3 * S,), f32)

    # per-variable embedding folded with the K / V projections (block-diagonal)
    off = 0
    for i, n in enumerate(names):
        we = params["emb_w"][n].astype(f32)            # (H, size_i)
        be = params["emb_b"][n].astype(f32)            # (H,)
        sz = we.shape[1]
        tok = i + 1
        w_big = w_big.at[off:off + sz, tok * H:(tok + 1) * H].set(we.T @ wk_t)
        w_big = w_big.at[off:off + sz, S + tok * H:S + (tok + 1) * H].set(we.T @ wv_t)
        b_big = b_big.at[tok * H:(tok + 1) * H].set(be @ wk_t + bk)
        b_big = b_big.at[S + tok * H:S + (tok + 1) * H].set(be @ wv_t + bv)
        off += sz

    # CLS token (+ projected context) -> K0 / V0 / Q (Q replicated per token slot)
    b_big = b_big.at[0:H].set(cls_eff @ wk_t + bk)
    b_big = b_big.at[S:S + H].set(cls_eff @ wv_t + bv)
    q_const = cls_eff @ wq_t + bq_s
    for t in range(NT):
        b_big = b_big.at[2 * S + t * H:2 * S + (t + 1) * H].set(q_const)
    if C:
        r0 = f_sum                                     # ctx rows sit right after x features
        w_big = w_big.at[r0:r0 + C, 0:H].set(ctx_w_t @ wk_t)
        w_big = w_big.at[r0:r0 + C, S:S + H].set(ctx_w_t @ wv_t)
        qc = ctx_w_t @ wq_t
        for t in range(NT):
            w_big = w_big.at[r0:r0 + C, 2 * S + t * H:2 * S + (t + 1) * H].set(qc)
    b_big = b_big.reshape(1, 3 * S)

    # ---- constant indicator matrices (hoisted out of the kernel, resident in VMEM) ----
    NC = NT * heads
    m_sum_np = np.zeros((S, NC), np.float32)           # head-sum:   qk lanes -> (token, head)
    m_bcast_np = np.zeros((NC, S), np.float32)         # broadcast:  (token, head) -> lanes
    head_avg_np = np.zeros((NC, V), np.float32)        # head-avg, CLS excluded
    for t in range(NT):
        for h in range(heads):
            c = t * heads + h
            rows = slice(t * H + h * dh, t * H + (h + 1) * dh)
            m_sum_np[rows, c] = 1.0
            m_bcast_np[c, rows] = 1.0
            if t >= 1:
                head_avg_np[c, t - 1] = 1.0 / heads
    m_sum = jnp.asarray(m_sum_np)
    m_bcast = jnp.asarray(m_bcast_np)
    head_avg = jnp.asarray(head_avg_np)

    # ---- token-sum + W_o + FF-Linear1 folded into one (S, 2H) weight ----
    wo_t = params["out_w"].astype(f32).T
    out_b = params["out_b"].astype(f32)
    w1_t = params["ff1_w"].astype(f32).T
    b1 = params["ff1_b"].astype(f32)
    w_attn = jnp.concatenate([wo_t, wo_t @ w1_t], axis=1)          # (H, 2H)
    w_af = jnp.zeros((S, 2 * H), f32)
    for t in range(NT):
        w_af = w_af.at[t * H:(t + 1) * H, :].set(w_attn)
    b_af = jnp.concatenate([out_b, out_b @ w1_t + b1]).reshape(1, 2 * H)
    w2 = params["ff2_w"].astype(f32).T
    b2 = params["ff2_b"].astype(f32).reshape(1, H)
    ln_g = params["ln_g"].astype(f32).reshape(1, H)
    ln_b = params["ln_b"].astype(f32).reshape(1, H)

    # ---- blocking / row padding ----
    bb, nblk = _choose_blocking(R)
    r_pad = bb * nblk
    if r_pad != R:
        xin = jnp.pad(xin, ((0, r_pad - R), (0, 0)))

    weights = [w_big, b_big, m_sum, m_bcast, head_avg, w_af, b_af, w2, b2, ln_g, ln_b]
    in_specs = ([pl.BlockSpec((bb, f_in), lambda i: (i, 0))]              # streamed rows
                + [pl.BlockSpec(w.shape, lambda i: (0, 0)) for w in weights])  # resident
    out_specs = [pl.BlockSpec((bb, H), lambda i: (i, 0)),
                 pl.BlockSpec((bb, V), lambda i: (i, 0))]

    kernel = functools.partial(vsn_kernel, hidden=H, n_heads=heads, n_vars=V,
                               sect=S, eps=EPS)

    out, wts = pl.pallas_call(
        kernel,
        out_shape=(jax.ShapeDtypeStruct((r_pad, H), f32),
                   jax.ShapeDtypeStruct((r_pad, V), f32)),
        grid_spec=pltpu.PrefetchScalarGridSpec(
            num_scalar_prefetch=0,
            grid=(nblk,),
            in_specs=in_specs,
            out_specs=out_specs,
        ),
        compiler_params=pltpu.CompilerParams(dimension_semantics=("parallel",)),
    )(xin, *weights)

    out = out[:R].reshape(B, T, H)
    wts = wts[:R].reshape(B, T, V)
    if T == 1:
        out = out[:, 0]
        wts = wts[:, 0]
    return out, wts


# --------------------------------------------------------------------------------------
# Plain-JAX reference (mirrors the PyTorch module math step by step)
# --------------------------------------------------------------------------------------
def reference_forward(x, context, params, input_sizes, hidden, n_heads):
    names = list(input_sizes)
    H = hidden
    dh = H // n_heads

    embs = []
    for n in names:
        v = x[n]
        if v.ndim == 2:
            v = v[:, None, :]
        embs.append(v @ params["emb_w"][n].T + params["emb_b"][n])
    tokens = jnp.stack(embs, axis=2)                  # (B, T, V, H)
    B, T, V, _ = tokens.shape
    R = B * T
    tok = tokens.reshape(R, V, H)

    cls = jnp.broadcast_to(params["cls"].reshape(1, 1, H), (R, 1, H))
    if context is not None:
        ctx = context
        if ctx.ndim == 2:
            ctx = jnp.broadcast_to(ctx[:, None, :], (B, T, ctx.shape[-1]))
        ctx = ctx.reshape(R, 1, -1)
        cls = cls + ctx @ params["ctx_w"].T + params["ctx_b"]

    attn_in = jnp.concatenate([cls, tok], axis=1)     # (R, V+1, H)
    in_w, in_b = params["in_w"], params["in_b"]
    q = attn_in[:, :1] @ in_w[:H].T + in_b[:H]
    k = attn_in @ in_w[H:2 * H].T + in_b[H:2 * H]
    v = attn_in @ in_w[2 * H:].T + in_b[2 * H:]

    qh = q.reshape(R, 1, n_heads, dh).transpose(0, 2, 1, 3)
    kh = k.reshape(R, V + 1, n_heads, dh).transpose(0, 2, 1, 3)
    vh = v.reshape(R, V + 1, n_heads, dh).transpose(0, 2, 1, 3)
    s = jnp.einsum("rhqd,rhkd->rhqk", qh, kh) / np.sqrt(dh)
    p = jax.nn.softmax(s, axis=-1)                    # (R, heads, 1, V+1)
    o = jnp.einsum("rhqk,rhkd->rhqd", p, vh).transpose(0, 2, 1, 3).reshape(R, 1, H)
    attn_out = o @ params["out_w"].T + params["out_b"]
    attn_w = p.mean(axis=1)                           # average over heads: (R, 1, V+1)
    vsel = attn_w[:, :, 1:]

    ff = jax.nn.relu(attn_out @ params["ff1_w"].T + params["ff1_b"])
    ff = ff @ params["ff2_w"].T + params["ff2_b"]
    y = attn_out + ff
    mu = y.mean(-1, keepdims=True)
    var = ((y - mu) ** 2).mean(-1, keepdims=True)
    out = (y - mu) / jnp.sqrt(var + EPS) * params["ln_g"] + params["ln_b"]
    return out.reshape(B, T, H), vsel.reshape(B, T, V)


# --------------------------------------------------------------------------------------
# Demo / correctness check
# --------------------------------------------------------------------------------------
def init_params(key, input_sizes, hidden, context_size):
    keys = iter(jax.random.split(key, 32))

    def rnd(shape, scale=0.1):
        return jax.random.normal(next(keys), shape, jnp.float32) * scale

    params = {
        "emb_w": {n: rnd((hidden, s)) for n, s in input_sizes.items()},
        "emb_b": {n: rnd((hidden,)) for n in input_sizes},
        "cls": rnd((1, 1, hidden), 0.5),
        "ctx_w": rnd((hidden, context_size)),
        "ctx_b": rnd((hidden,)),
        "in_w": rnd((3 * hidden, hidden)),
        "in_b": rnd((3 * hidden,)),
        "out_w": rnd((hidden, hidden)),
        "out_b": rnd((hidden,)),
        "ff1_w": rnd((hidden, hidden)),
        "ff1_b": rnd((hidden,)),
        "ff2_w": rnd((hidden, hidden)),
        "ff2_b": rnd((hidden,)),
        "ln_g": jnp.ones((hidden,), jnp.float32),
        "ln_b": jnp.zeros((hidden,), jnp.float32),
    }
    return params


if __name__ == "__main__":
    input_sizes = {"temp": 5, "load": 8, "price": 3, "calendar": 12}   # 4 variables
    hidden, n_heads, context_size = 32, 4, 16
    B, T = 2, 8

    key = jax.random.PRNGKey(0)
    k_par, k_ctx, *k_vars = jax.random.split(key, 2 + len(input_sizes))
    params = init_params(k_par, input_sizes, hidden, context_size)
    x = {n: jax.random.normal(kv, (B, T, s), jnp.float32)
         for (n, s), kv in zip(input_sizes.items(), k_vars)}
    context = jax.random.normal(k_ctx, (B, T, context_size), jnp.float32)

    out, wts = transformer_vsn_forward(x, params, input_sizes, hidden, n_heads,
                                       context=context)
    out = jax.block_until_ready(out)
    wts = jax.block_until_ready(wts)

    ref_out, ref_wts = reference_forward(x, context, params, input_sizes, hidden, n_heads)
    np.testing.assert_allclose(np.asarray(out), np.asarray(ref_out), rtol=2e-3, atol=2e-3)
    np.testing.assert_allclose(np.asarray(wts), np.asarray(ref_wts), rtol=2e-3, atol=2e-3)

    print("KERNEL_OK")
</pallas_src>

<mosaic_0001>
module attributes {stable_mosaic.version = 11 : i64} {
  func.func @vsn_kernel(%arg0: i32, %arg1: memref<8x48xf32, #tpu.memory_space<vmem>>, %arg2: memref<48x768xf32, #tpu.memory_space<vmem>>, %arg3: memref<1x768xf32, #tpu.memory_space<vmem>>, %arg4: memref<256x20xf32, #tpu.memory_space<vmem>>, %arg5: memref<20x256xf32, #tpu.memory_space<vmem>>, %arg6: memref<20x4xf32, #tpu.memory_space<vmem>>, %arg7: memref<256x64xf32, #tpu.memory_space<vmem>>, %arg8: memref<1x64xf32, #tpu.memory_space<vmem>>, %arg9: memref<32x32xf32, #tpu.memory_space<vmem>>, %arg10: memref<1x32xf32, #tpu.memory_space<vmem>>, %arg11: memref<1x32xf32, #tpu.memory_space<vmem>>, %arg12: memref<1x32xf32, #tpu.memory_space<vmem>>, %arg13: memref<8x32xf32, #tpu.memory_space<vmem>>, %arg14: memref<8x4xf32, #tpu.memory_space<vmem>>) attributes {dimension_semantics = [#tpu.dimension_semantics<parallel>], iteration_bounds = array<i64: 2>, scalar_prefetch = 0 : i64, scratch_operands = 0 : i64, tpu.core_type = #tpu.core_type<tc>, window_params = [{transform_indices = @transform_0, window_bounds = array<i64: 8, 48>}, {pipeline_mode = #tpu.pipeline_mode<synchronous>, transform_indices = @transform_1, window_bounds = array<i64: 48, 768>}, {pipeline_mode = #tpu.pipeline_mode<synchronous>, transform_indices = @transform_2, window_bounds = array<i64: 1, 768>}, {pipeline_mode = #tpu.pipeline_mode<synchronous>, transform_indices = @transform_3, window_bounds = array<i64: 256, 20>}, {pipeline_mode = #tpu.pipeline_mode<synchronous>, transform_indices = @transform_4, window_bounds = array<i64: 20, 256>}, {pipeline_mode = #tpu.pipeline_mode<synchronous>, transform_indices = @transform_5, window_bounds = array<i64: 20, 4>}, {pipeline_mode = #tpu.pipeline_mode<synchronous>, transform_indices = @transform_6, window_bounds = array<i64: 256, 64>}, {pipeline_mode = #tpu.pipeline_mode<synchronous>, transform_indices = @transform_7, window_bounds = array<i64: 1, 64>}, {pipeline_mode = #tpu.pipeline_mode<synchronous>, transform_indices = @transform_8, window_bounds = array<i64: 32, 32>}, {pipeline_mode = #tpu.pipeline_mode<synchronous>, transform_indices = @transform_9, window_bounds = array<i64: 1, 32>}, {pipeline_mode = #tpu.pipeline_mode<synchronous>, transform_indices = @transform_10, window_bounds = array<i64: 1, 32>}, {pipeline_mode = #tpu.pipeline_mode<synchronous>, transform_indices = @transform_11, window_bounds = array<i64: 1, 32>}, {transform_indices = @transform_12, window_bounds = array<i64: 8, 32>}, {transform_indices = @transform_13, window_bounds = array<i64: 8, 4>}]} {
    %c0 = arith.constant 0 : index
    %c0_0 = arith.constant 0 : index
    %0 = vector.load %arg1[%c0, %c0_0] : memref<8x48xf32, #tpu.memory_space<vmem>>, vector<8x48xf32>
    %c0_1 = arith.constant 0 : index
    %c0_2 = arith.constant 0 : index
    %1 = vector.load %arg2[%c0_1, %c0_2] : memref<48x768xf32, #tpu.memory_space<vmem>>, vector<48x768xf32>
    %cst = arith.constant dense<0.000000e+00> : vector<8x768xf32>
    %2 = tpu.matmul %0, %1, %cst {dimension_numbers = #tpu.dot_dimension_numbers<[1], [0], [0], [1], [0, 0, 1, 1], [], []>} : vector<8x48xf32>, vector<48x768xf32>, vector<8x768xf32> -> vector<8x768xf32>
    %c0_3 = arith.constant 0 : index
    %c0_4 = arith.constant 0 : index
    %3 = vector.load %arg3[%c0_3, %c0_4] : memref<1x768xf32, #tpu.memory_space<vmem>>, vector<1x768xf32>
    %4 = vector.broadcast %3 : vector<1x768xf32> to vector<8x768xf32>
    %5 = arith.addf %2, %4 : vector<8x768xf32>
    %6 = vector.extract_strided_slice %5 {offsets = [0, 0], sizes = [8, 256], strides = [1, 1]} : vector<8x768xf32> to vector<8x256xf32>
    %7 = vector.extract_strided_slice %5 {offsets = [0, 256], sizes = [8, 256], strides = [1, 1]} : vector<8x768xf32> to vector<8x256xf32>
    %8 = vector.extract_strided_slice %5 {offsets = [0, 512], sizes = [8, 256], strides = [1, 1]} : vector<8x768xf32> to vector<8x256xf32>
    %9 = arith.mulf %8, %6 : vector<8x256xf32>
    %c0_5 = arith.constant 0 : index
    %c0_6 = arith.constant 0 : index
    %10 = vector.load %arg4[%c0_5, %c0_6] : memref<256x20xf32, #tpu.memory_space<vmem>>, vector<256x20xf32>
    %cst_7 = arith.constant dense<0.000000e+00> : vector<8x20xf32>
    %11 = tpu.matmul %9, %10, %cst_7 {dimension_numbers = #tpu.dot_dimension_numbers<[1], [0], [0], [1], [0, 0, 1, 1], [], []>} : vector<8x256xf32>, vector<256x20xf32>, vector<8x20xf32> -> vector<8x20xf32>
    %12 = vector.extract_strided_slice %11 {offsets = [0, 0], sizes = [8, 4], strides = [1, 1]} : vector<8x20xf32> to vector<8x4xf32>
    %13 = vector.extract_strided_slice %11 {offsets = [0, 4], sizes = [8, 4], strides = [1, 1]} : vector<8x20xf32> to vector<8x4xf32>
    %14 = vector.extract_strided_slice %11 {offsets = [0, 8], sizes = [8, 4], strides = [1, 1]} : vector<8x20xf32> to vector<8x4xf32>
    %15 = vector.extract_strided_slice %11 {offsets = [0, 12], sizes = [8, 4], strides = [1, 1]} : vector<8x20xf32> to vector<8x4xf32>
    %16 = vector.extract_strided_slice %11 {offsets = [0, 16], sizes = [8, 4], strides = [1, 1]} : vector<8x20xf32> to vector<8x4xf32>
    %17 = arith.maximumf %12, %13 : vector<8x4xf32>
    %18 = arith.maximumf %17, %14 : vector<8x4xf32>
    %19 = arith.maximumf %18, %15 : vector<8x4xf32>
    %20 = arith.maximumf %19, %16 : vector<8x4xf32>
    %21 = tpu.concatenate %20, %20, %20, %20, %20 in 1 : vector<8x4xf32>, vector<8x4xf32>, vector<8x4xf32>, vector<8x4xf32>, vector<8x4xf32> -> vector<8x20xf32>
    %22 = arith.subf %11, %21 : vector<8x20xf32>
    %23 = math.exp %22 : vector<8x20xf32>
    %24 = vector.extract_strided_slice %23 {offsets = [0, 0], sizes = [8, 4], strides = [1, 1]} : vector<8x20xf32> to vector<8x4xf32>
    %25 = vector.extract_strided_slice %23 {offsets = [0, 4], sizes = [8, 4], strides = [1, 1]} : vector<8x20xf32> to vector<8x4xf32>
    %26 = arith.addf %24, %25 : vector<8x4xf32>
    %27 = vector.extract_strided_slice %23 {offsets = [0, 8], sizes = [8, 4], strides = [1, 1]} : vector<8x20xf32> to vector<8x4xf32>
    %28 = arith.addf %26, %27 : vector<8x4xf32>
    %29 = vector.extract_strided_slice %23 {offsets = [0, 12], sizes = [8, 4], strides = [1, 1]} : vector<8x20xf32> to vector<8x4xf32>
    %30 = arith.addf %28, %29 : vector<8x4xf32>
    %31 = vector.extract_strided_slice %23 {offsets = [0, 16], sizes = [8, 4], strides = [1, 1]} : vector<8x20xf32> to vector<8x4xf32>
    %32 = arith.addf %30, %31 : vector<8x4xf32>
    %33 = tpu.reciprocal %32 : vector<8x4xf32> -> vector<8x4xf32>
    %34 = tpu.concatenate %33, %33, %33, %33, %33 in 1 : vector<8x4xf32>, vector<8x4xf32>, vector<8x4xf32>, vector<8x4xf32>, vector<8x4xf32> -> vector<8x20xf32>
    %35 = arith.mulf %23, %34 : vector<8x20xf32>
    %c0_8 = arith.constant 0 : index
    %c0_9 = arith.constant 0 : index
    %36 = vector.load %arg5[%c0_8, %c0_9] : memref<20x256xf32, #tpu.memory_space<vmem>>, vector<20x256xf32>
    %cst_10 = arith.constant dense<0.000000e+00> : vector<8x256xf32>
    %37 = tpu.matmul %35, %36, %cst_10 {dimension_numbers = #tpu.dot_dimension_numbers<[1], [0], [0], [1], [0, 0, 1, 1], [], []>} : vector<8x20xf32>, vector<20x256xf32>, vector<8x256xf32> -> vector<8x256xf32>
    %38 = arith.mulf %37, %7 : vector<8x256xf32>
    %c0_11 = arith.constant 0 : index
    %c0_12 = arith.constant 0 : index
    %39 = vector.load %arg7[%c0_11, %c0_12] : memref<256x64xf32, #tpu.memory_space<vmem>>, vector<256x64xf32>
    %cst_13 = arith.constant dense<0.000000e+00> : vector<8x64xf32>
    %40 = tpu.matmul %38, %39, %cst_13 {dimension_numbers = #tpu.dot_dimension_numbers<[1], [0], [0], [1], [0, 0, 1, 1], [], []>} : vector<8x256xf32>, vector<256x64xf32>, vector<8x64xf32> -> vector<8x64xf32>
    %c0_14 = arith.constant 0 : index
    %c0_15 = arith.constant 0 : index
    %41 = vector.load %arg8[%c0_14, %c0_15] : memref<1x64xf32, #tpu.memory_space<vmem>>, vector<1x64xf32>
    %42 = vector.broadcast %41 : vector<1x64xf32> to vector<8x64xf32>
    %43 = arith.addf %40, %42 : vector<8x64xf32>
    %44 = vector.extract_strided_slice %43 {offsets = [0, 0], sizes = [8, 32], strides = [1, 1]} : vector<8x64xf32> to vector<8x32xf32>
    %45 = vector.extract_strided_slice %43 {offsets = [0, 32], sizes = [8, 32], strides = [1, 1]} : vector<8x64xf32> to vector<8x32xf32>
    %cst_16 = arith.constant 0.000000e+00 : f32
    %46 = vector.broadcast %cst_16 : f32 to vector<8x32xf32>
    %47 = arith.maximumf %45, %46 : vector<8x32xf32>
    %c0_17 = arith.constant 0 : index
    %c0_18 = arith.constant 0 : index
    %48 = vector.load %arg9[%c0_17, %c0_18] : memref<32x32xf32, #tpu.memory_space<vmem>>, vector<32x32xf32>
    %cst_19 = arith.constant dense<0.000000e+00> : vector<8x32xf32>
    %49 = tpu.matmul %47, %48, %cst_19 {dimension_numbers = #tpu.dot_dimension_numbers<[1], [0], [0], [1], [0, 0, 1, 1], [], []>} : vector<8x32xf32>, vector<32x32xf32>, vector<8x32xf32> -> vector<8x32xf32>
    %c0_20 = arith.constant 0 : index
    %c0_21 = arith.constant 0 : index
    %50 = vector.load %arg10[%c0_20, %c0_21] : memref<1x32xf32, #tpu.memory_space<vmem>>, vector<1x32xf32>
    %51 = vector.broadcast %50 : vector<1x32xf32> to vector<8x32xf32>
    %52 = arith.addf %49, %51 : vector<8x32xf32>
    %53 = arith.addf %44, %52 : vector<8x32xf32>
    %cst_22 = arith.constant dense<0.000000e+00> : vector<8xf32>
    %54 = vector.multi_reduction <add>, %53, %cst_22 [1] : vector<8x32xf32> to vector<8xf32>
    %55 = vector.shape_cast %54 : vector<8xf32> to vector<8x1xf32>
    %cst_23 = arith.constant 3.200000e+01 : f32
    %56 = vector.broadcast %cst_23 : f32 to vector<8x1xf32>
    %57 = arith.divf %55, %56 : vector<8x1xf32>
    %58 = vector.broadcast %57 : vector<8x1xf32> to vector<8x32xf32>
    %59 = arith.subf %53, %58 : vector<8x32xf32>
    %60 = arith.mulf %59, %59 : vector<8x32xf32>
    %cst_24 = arith.constant dense<0.000000e+00> : vector<8xf32>
    %61 = vector.multi_reduction <add>, %60, %cst_24 [1] : vector<8x32xf32> to vector<8xf32>
    %62 = vector.shape_cast %61 : vector<8xf32> to vector<8x1xf32>
    %cst_25 = arith.constant 3.200000e+01 : f32
    %63 = vector.broadcast %cst_25 : f32 to vector<8x1xf32>
    %64 = arith.divf %62, %63 : vector<8x1xf32>
    %65 = vector.broadcast %57 : vector<8x1xf32> to vector<8x32xf32>
    %66 = arith.subf %53, %65 : vector<8x32xf32>
    %cst_26 = arith.constant 9.99999974E-6 : f32
    %67 = vector.broadcast %cst_26 : f32 to vector<8x1xf32>
    %68 = arith.addf %64, %67 : vector<8x1xf32>
    %69 = math.rsqrt %68 : vector<8x1xf32>
    %70 = vector.broadcast %69 : vector<8x1xf32> to vector<8x32xf32>
    %71 = arith.mulf %66, %70 : vector<8x32xf32>
    %c0_27 = arith.constant 0 : index
    %c0_28 = arith.constant 0 : index
    %72 = vector.load %arg11[%c0_27, %c0_28] : memref<1x32xf32, #tpu.memory_space<vmem>>, vector<1x32xf32>
    %73 = vector.broadcast %72 : vector<1x32xf32> to vector<8x32xf32>
    %74 = arith.mulf %71, %73 : vector<8x32xf32>
    %c0_29 = arith.constant 0 : index
    %c0_30 = arith.constant 0 : index
    %75 = vector.load %arg12[%c0_29, %c0_30] : memref<1x32xf32, #tpu.memory_space<vmem>>, vector<1x32xf32>
    %76 = vector.broadcast %75 : vector<1x32xf32> to vector<8x32xf32>
    %77 = arith.addf %74, %76 : vector<8x32xf32>
    %c0_31 = arith.constant 0 : index
    %c0_32 = arith.constant 0 : index
    %78 = vector.load %arg13[%c0_31, %c0_32] : memref<8x32xf32, #tpu.memory_space<vmem>>, vector<8x32xf32>
    tpu.vector_store %arg13[%c0_31, %c0_32], %77 {strides = array<i32>} : memref<8x32xf32, #tpu.memory_space<vmem>>, vector<8x32xf32>,
    %c0_33 = arith.constant 0 : index
    %c0_34 = arith.constant 0 : index
    %79 = vector.load %arg6[%c0_33, %c0_34] : memref<20x4xf32, #tpu.memory_space<vmem>>, vector<20x4xf32>
    %cst_35 = arith.constant dense<0.000000e+00> : vector<8x4xf32>
    %80 = tpu.matmul %35, %79, %cst_35 {dimension_numbers = #tpu.dot_dimension_numbers<[1], [0], [0], [1], [0, 0, 1, 1], [], []>} : vector<8x20xf32>, vector<20x4xf32>, vector<8x4xf32> -> vector<8x4xf32>
    %c0_36 = arith.constant 0 : index
    %c0_37 = arith.constant 0 : index
    %81 = vector.load %arg14[%c0_36, %c0_37] : memref<8x4xf32, #tpu.memory_space<vmem>>, vector<8x4xf32>
    tpu.vector_store %arg14[%c0_36, %c0_37], %80 {strides = array<i32>} : memref<8x4xf32, #tpu.memory_space<vmem>>, vector<8x4xf32>,
    return
  }
  func.func @transform_0(%arg0: i32) -> (i32, i32) {
    %c0_i32 = arith.constant 0 : i32
    %c0_i32_0 = arith.constant 0 : i32
    return %arg0, %c0_i32 : i32, i32
  }
  func.func @transform_1(%arg0: i32) -> (i32, i32) {
    %c0_i32 = arith.constant 0 : i32
    %c0_i32_0 = arith.constant 0 : i32
    %c0_i32_1 = arith.constant 0 : i32
    return %c0_i32, %c0_i32_0 : i32, i32
  }
  func.func @transform_2(%arg0: i32) -> (i32, i32) {
    %c0_i32 = arith.constant 0 : i32
    %c0_i32_0 = arith.constant 0 : i32
    %c0_i32_1 = arith.constant 0 : i32
    return %c0_i32, %c0_i32_0 : i32, i32
  }
  func.func @transform_3(%arg0: i32) -> (i32, i32) {
    %c0_i32 = arith.constant 0 : i32
    %c0_i32_0 = arith.constant 0 : i32
    %c0_i32_1 = arith.constant 0 : i32
    return %c0_i32, %c0_i32_0 : i32, i32
  }
  func.func @transform_4(%arg0: i32) -> (i32, i32) {
    %c0_i32 = arith.constant 0 : i32
    %c0_i32_0 = arith.constant 0 : i32
    %c0_i32_1 = arith.constant 0 : i32
    return %c0_i32, %c0_i32_0 : i32, i32
  }
  func.func @transform_5(%arg0: i32) -> (i32, i32) {
    %c0_i32 = arith.constant 0 : i32
    %c0_i32_0 = arith.constant 0 : i32
    %c0_i32_1 = arith.constant 0 : i32
    return %c0_i32, %c0_i32_0 : i32, i32
  }
  func.func @transform_6(%arg0: i32) -> (i32, i32) {
    %c0_i32 = arith.constant 0 : i32
    %c0_i32_0 = arith.constant 0 : i32
    %c0_i32_1 = arith.constant 0 : i32
    return %c0_i32, %c0_i32_0 : i32, i32
  }
  func.func @transform_7(%arg0: i32) -> (i32, i32) {
    %c0_i32 = arith.constant 0 : i32
    %c0_i32_0 = arith.constant 0 : i32
    %c0_i32_1 = arith.constant 0 : i32
    return %c0_i32, %c0_i32_0 : i32, i32
  }
  func.func @transform_8(%arg0: i32) -> (i32, i32) {
    %c0_i32 = arith.constant 0 : i32
    %c0_i32_0 = arith.constant 0 : i32
    %c0_i32_1 = arith.constant 0 : i32
    return %c0_i32, %c0_i32_0 : i32, i32
  }
  func.func @transform_9(%arg0: i32) -> (i32, i32) {
    %c0_i32 = arith.constant 0 : i32
    %c0_i32_0 = arith.constant 0 : i32
    %c0_i32_1 = arith.constant 0 : i32
    return %c0_i32, %c0_i32_0 : i32, i32
  }
  func.func @transform_10(%arg0: i32) -> (i32, i32) {
    %c0_i32 = arith.constant 0 : i32
    %c0_i32_0 = arith.constant 0 : i32
    %c0_i32_1 = arith.constant 0 : i32
    return %c0_i32, %c0_i32_0 : i32, i32
  }
  func.func @transform_11(%arg0: i32) -> (i32, i32) {
    %c0_i32 = arith.constant 0 : i32
    %c0_i32_0 = arith.constant 0 : i32
    %c0_i32_1 = arith.constant 0 : i32
    return %c0_i32, %c0_i32_0 : i32, i32
  }
  func.func @transform_12(%arg0: i32) -> (i32, i32) {
    %c0_i32 = arith.constant 0 : i32
    %c0_i32_0 = arith.constant 0 : i32
    return %arg0, %c0_i32 : i32, i32
  }
  func.func @transform_13(%arg0: i32) -> (i32, i32) {
    %c0_i32 = arith.constant 0 : i32
    %c0_i32_0 = arith.constant 0 : i32
    return %arg0, %c0_i32 : i32, i32
  }
}

</mosaic_0001>

<bundles_post_ra>
// kernel: tpu_custom_call.1
= control target key start
LH: loop header
LB: loop body
LE: loop exit
PB: predicated region body
PF: predicated region fallthrough
CT: control target
= control target key end

     0   :  { %19 = vsyncpa [#allocation3], 0  ;;  %s2390_s0 = inlined_call_operand.vmem [shape: f32[16,48], index: 0, kind: input, shape index: {}]   ;;  %s2391_s1 = inlined_call_operand.vmem [shape: f32[48,768], index: 1, kind: input, shape index: {}]   ;;  %s2392_s2 = inlined_call_operand.vmem [shape: f32[1,768], index: 2, kind: input, shape index: {}]   ;;  %s2393_s3 = inlined_call_operand.vmem [shape: f32[256,20], index: 3, kind: input, shape index: {}]   ;;  %s2394_s4 = inlined_call_operand.vmem [shape: f32[20,256], index: 4, kind: input, shape index: {}]   ;;  %s2395_s5 = inlined_call_operand.vmem [shape: f32[20,4], index: 5, kind: input, shape index: {}]   ;;  %s2396_s6 = inlined_call_operand.vmem [shape: f32[256,64], index: 6, kind: input, shape index: {}]   ;;  %s2397_s7 = inlined_call_operand.vmem [shape: f32[1,64], index: 7, kind: input, shape index: {}]   ;;  %s2398_s8 = inlined_call_operand.vmem [shape: f32[32,32], index: 8, kind: input, shape index: {}]   ;;  %s2399_s9 = inlined_call_operand.vmem [shape: f32[1,32], index: 9, kind: input, shape index: {}]   ;;  %s2400_s10 = inlined_call_operand.vmem [shape: f32[1,32], index: 10, kind: input, shape index: {}]   ;;  %s2401_s11 = inlined_call_operand.vmem [shape: f32[1,32], index: 11, kind: input, shape index: {}]   ;;  %s2402_s12 = inlined_call_operand.hbm [shape: f32[16,32], index: 12, kind: output, shape index: {0}]   ;;  %s2403_s13 = inlined_call_operand.vmem [shape: f32[16,4], index: 13, kind: output, shape index: {1}]  }
   0x1   :  { %21 = vsyncpa [#allocation3 + $0x1], 0  ;;  %s1854_s25 = smov 0   ;;  %s1856_s26 = smov 0  }
   0x2   :  { %s1858_s27 = smov 0   ;;  %s1860_s28 = smov 0  }
   0x3 LB: > { %2410 = sst [smem:[#allocation5_spill]] %s1757_s25  ;;  %s1875_s29 = sadd.s32 4294967295, %s1769_s28   ;;  %s1769_s28 = sphi %s1860_s28, %s2420_s28   ;;  %s1765_s27 = sphi %s1858_s27, %s2422_s27   ;;  %s1761_s26 = sphi %s1856_s26, %s2424_s26   ;;  %s1757_s25 = sphi %s1854_s25, %s2423_s25  }
   0x4   : > { %2411 = sst [smem:[#allocation6_spill]] %s1765_s27  ;;  %s1414_s30 = sadd.s32 4294967294, %s1769_s28  }
   0x5   : > { %s1879_s14 = sadd.s32 1, %s1769_s28   ;;  %s291_s15 = sadd.s32 1, %s1765_s27 }
   0x6   : > { %2412 = sst [smem:[#allocation7_spill]] %s1879_s14  ;;  %s288_s16 = ssub.s32 %s1769_s28, %s1879_s14 }
   0x7   : > { %p301_p0 = scmp.ne.s32.totalorder %s1765_s27, %s1761_s26  ;;  %p289_p1 = scmp.eq.s32.totalorder %s288_s16, 0 }
   0x8   : > { %p302_p2 = scmp.eq.s32.totalorder %s1875_s29, 1  ;;  %p307_p3 = scmp.ne.s32.totalorder %s1761_s26, %s1757_s25 }
   0x9   : > { %p308_p4 = scmp.eq.s32.totalorder %s1414_s30, 1  ;;  %p1417_p7 = scmp.ge.s32.totalorder %s1769_s28, 1 }
   0xa   : > { %s1890_s17 = scalar_select %p289_p1, %s1765_s27, %s291_s15  }
   0xb   : > { %p1892_p5 = por %p302_p2, %p301_p0  ;;  %p1896_p6 = por %p308_p4, %p307_p3 }
   0xc   : > { %2413 = sst [smem:[#allocation8_spill]] %s1890_s17  ;;  %p392_p8 = scmp.lt.s32.totalorder %s1769_s28, 3 }
   0xd   : > { %s2415_s19 = scalar_select %p1896_p6, 1, 0 }
   0xe   : > { %p393_p9 = pnand %p1417_p7, %p392_p8 }
   0xf   : > { %2416 = sst [smem:[#allocation9_spill]] %s2415_s19  ;;  %v449_v0 = vld [vmem:[%s2391_s1 + $0x8] sm:$0xff] (!%p393_p9)  ;;  %v455_v1 = vld [vmem:[%s2391_s1 + $0x38] sm:$0xff] (!%p393_p9)  ;;  %v448_v2 = vld [vmem:[%s2391_s1] sm:$0xff] (!%p393_p9)  ;;  %p439_p10 = scmp.lt.s32.totalorder (!%p393_p9), %s1875_s29, 1  ;;  %v1771_v7 = vmov (!%p393_p9), 0.0  }
  0x10   : > { %396 = sbr.rel (%p393_p9) target bundleno = 2086 (0x826), region = 68  ;;  %v1537_v3 = vpack.c.bf16 (!%p393_p9), %v455_v1, %v449_v0  ;;  %v454_v4 = vld [vmem:[%s2391_s1 + $0x30] sm:$0xff] (!%p393_p9)  ;;  %v461_v5 = vld [vmem:[%s2391_s1 + $0x68] sm:$0xff] (!%p393_p9)  ;;  %v467_v6 = vld [vmem:[%s2391_s1 + $0x98] sm:$0xff] (!%p393_p9)  ;;  %584 = vmatprep.mubr.f32.mxu0 (!%p393_p9), %v1771_v7  ;;  %655 = vmatprep.mubr.f32.mxu1 (!%p393_p9), %v1771_v7  ;;  %vm516_vm0 = vcmask (!%p393_p9), 392192   ;;  %s1772_s27 = smov (!%p393_p9), 116  }
  0x11   : > { %v1539_v8 = vpack.c.bf16 (!%p393_p9), %v454_v4, %v448_v2  ;;  %v1541_v9 = vpack.c.bf16 (!%p393_p9), %v467_v6, %v461_v5  ;;  %v460_v10 = vld [vmem:[%s2391_s1 + $0x60] sm:$0xff] (!%p393_p9)  ;;  %v466_v11 = vld [vmem:[%s2391_s1 + $0x90] sm:$0xff] (!%p393_p9)  ;;  %v473_v12 = vld [vmem:[%s2391_s1 + $0xc8] sm:$0xff] (!%p393_p9)  ;;  %s1773_s17 = smov (!%p393_p9), 124   ;;  %s1774_s16 = smov (!%p393_p9), 112   ;;  %vm867_vm1 = vcmask (!%p393_p9), 31744  }
  0x12   : > { %1538 = vmatprep.subr.bf16.mxu0 (!%p393_p9), %v1537_v3  ;;  %v479_v13 = vld [vmem:[%s2391_s1 + $0xf8] sm:$0xff] (!%p393_p9)  ;;  %v1543_v14 = vpack.c.bf16 (!%p393_p9), %v466_v11, %v460_v10  ;;  %v472_v16 = vld [vmem:[%s2391_s1 + $0xc0] sm:$0xff] (!%p393_p9)  ;;  %v478_v17 = vld [vmem:[%s2391_s1 + $0xf0] sm:$0xff] (!%p393_p9)  ;;  %s1776_s14 = smov (!%p393_p9), 8   ;;  %s1777_s19 = smov (!%p393_p9), 4   ;;  %vm869_vm2 = vcmask (!%p393_p9), 64512  }
  0x13   : > { %1540 = vmatpush1.bf16.msra.mxu0 (!%p393_p9), %v1539_v8  ;;  %v1545_v15 = vpack.c.bf16 (!%p393_p9), %v479_v13, %v473_v12  ;;  %v453_v18 = vld [vmem:[%s2391_s1 + $0x28] sm:$0xff] (!%p393_p9)  ;;  %v459_v19 = vld [vmem:[%s2391_s1 + $0x58] sm:$0xff] (!%p393_p9)  ;;  %v452_v20 = vld [vmem:[%s2391_s1 + $0x20] sm:$0xff] (!%p393_p9)  ;;  %v1547_v22 = vpack.c.bf16 (!%p393_p9), %v478_v17, %v472_v16  ;;  %s1778_s25 = smov (!%p393_p9), 16   ;;  %s1779_s20 = smov (!%p393_p9), 12   ;;  %vm871_vm3 = vcmask (!%p393_p9), 97280  }
  0x14   : > { %1542 = vmatprep.subr.bf16.mxu0 (!%p393_p9), %v1541_v9  ;;  %v458_v21 = vld [vmem:[%s2391_s1 + $0x50] sm:$0xff] (!%p393_p9)  ;;  %v465_v23 = vld [vmem:[%s2391_s1 + $0x88] sm:$0xff] (!%p393_p9)  ;;  %v471_v24 = vld [vmem:[%s2391_s1 + $0xb8] sm:$0xff] (!%p393_p9)  ;;  %v1561_v27 = vpack.c.bf16 (!%p393_p9), %v459_v19, %v453_v18  ;;  %vm873_vm4 = vcmask (!%p393_p9), 130048   ;;  %vm924_vm5 = vcmask (!%p393_p9), 1043456   ;;  %vm920_vm6 = vcmask (!%p393_p9), 162816  }
  0x15   : > { %v451_v25 = vld [vmem:[%s2391_s1 + $0x18] sm:$0xff] (!%p393_p9)  ;;  %v457_v26 = vld [vmem:[%s2391_s1 + $0x48] sm:$0xff] (!%p393_p9)  ;;  %v450_v29 = vld [vmem:[%s2391_s1 + $0x10] sm:$0xff] (!%p393_p9)  ;;  %v1563_v40 = vpack.c.bf16 (!%p393_p9), %v458_v21, %v452_v20  ;;  %v1565_v41 = vpack.c.bf16 (!%p393_p9), %v471_v24, %v465_v23  ;;  %vm1781_vm7 = vmmov (!%p393_p9), 0   ;;  %vm1128_vm8 = vcmask (!%p393_p9), 261120  }
  0x16   : > { %v1549_v28 = vpack.c.bf16 (!%p393_p9), %v457_v26, %v451_v25  ;;  %v456_v30 = vld [vmem:[%s2391_s1 + $0x40] sm:$0xff] (!%p393_p9)  ;;  %v463_v31 = vld [vmem:[%s2391_s1 + $0x78] sm:$0xff] (!%p393_p9)  ;;  %v469_v33 = vld [vmem:[%s2391_s1 + $0xa8] sm:$0xff] (!%p393_p9) }
  0x17   : > { %s1933_s15 = scalar_select %p439_p10, %s1875_s29, 1  ;;  %1544 = vmatpush1.bf16.msra.mxu0 %v1543_v14  ;;  %v1551_v32 = vpack.c.bf16 %v456_v30, %v450_v29  ;;  %v462_v34 = vld [vmem:[%s2391_s1 + $0x70] sm:$0xff]  ;;  %v468_v35 = vld [vmem:[%s2391_s1 + $0xa0] sm:$0xff]  ;;  %v1553_v36 = vpack.c.bf16 %v469_v33, %v463_v31  ;;  %v475_v37 = vld [vmem:[%s2391_s1 + $0xd8] sm:$0xff] }
  0x18   : > { %1546 = vmatprep.subr.bf16.mxu0 %v1545_v15  ;;  %1550 = vmatprep.subr.bf16.mxu1 %v1549_v28  ;;  %v481_v38 = vld [vmem:[%s2391_s1 + $0x108] sm:$0xff]  ;;  %v464_v42 = vld [vmem:[%s2391_s1 + $0x80] sm:$0xff]  ;;  %v470_v43 = vld [vmem:[%s2391_s1 + $0xb0] sm:$0xff]  ;;  %v1555_v45 = vpack.c.bf16 %v468_v35, %v462_v34 }
  0x19   : > { %s2409_s30 = sshll.u32 %s1933_s15, 3  ;;  %1552 = vmatpush1.bf16.msra.mxu1 %v1551_v32  ;;  %v477_v44 = vld [vmem:[%s2391_s1 + $0xe8] sm:$0xff]  ;;  %v483_v46 = vld [vmem:[%s2391_s1 + $0x118] sm:$0xff]  ;;  %v1557_v47 = vpack.c.bf16 %v481_v38, %v475_v37  ;;  %v474_v48 = vld [vmem:[%s2391_s1 + $0xd0] sm:$0xff]  ;;  %v1567_v52 = vpack.c.bf16 %v470_v43, %v464_v42 }
  0x1a   : > { %s442_s21 = scalar_lea.vmem %s2390_s0, %s2409_s30  ;;  %1554 = vmatprep.subr.bf16.mxu1 %v1553_v36  ;;  %v480_v49 = vld [vmem:[%s2391_s1 + $0x100] sm:$0xff]  ;;  %v752_v51 = vld [vmem:[%s2393_s3 + $0x88] sm:$0xff]  ;;  %v1569_v53 = vpack.c.bf16 %v483_v46, %v477_v44  ;;  %v482_v55 = vld [vmem:[%s2391_s1 + $0x110] sm:$0xff]  ;;  %s1775_s30 = smov 120  }
  0x1b   : > { %1548 = vmatpush1.bf16.msra.mxu0 %v1547_v22  ;;  %v447_v39 = vld [vmem:[%s442_s21] sm:$0xff]  ;;  %v1559_v56 = vpack.c.bf16 %v480_v49, %v474_v48  ;;  %v736_v59 = vld [vmem:[%s2393_s3 + $0x8] sm:$0xff]  ;;  %v753_v60 = vld [vmem:[%s2393_s3 + $0x90] sm:$0xff] }
  0x1c   : > { %1562 = vmatprep.subr.bf16.mxu0 %v1561_v27  ;;  %v751_v50 = vld [vmem:[%s2393_s3 + $0x80] sm:$0xff]  ;;  %v754_v61 = vld [vmem:[%s2393_s3 + $0x98] sm:$0xff]  ;;  %v737_v1 = vld [vmem:[%s2393_s3 + $0x10] sm:$0xff] }
  0x1d   : > { %v476_v54 = vld [vmem:[%s2391_s1 + $0xe0] sm:$0xff]  ;;  %1556 = vmatpush1.bf16.msra.mxu1 %v1555_v45  ;;  %v1573_v57 = vpack.c.bf16 %v752_v51, %v751_v50  ;;  %v1577_v0 = vpack.c.bf16 %v754_v61, %v753_v60  ;;  %v738_v2 = vld [vmem:[%s2393_s3 + $0x18] sm:$0xff]  ;;  %v756_v4 = vld [vmem:[%s2393_s3 + $0xa8] sm:$0xff] }
  0x1e   : > { %1421 = vmatmul.mubr.msk.f32.vlgmr.msra.gmra.mrb[0].mxu0 %vm516_vm0, %v447_v39  ;;  %1558 = vmatprep.subr.bf16.mxu1 %v1557_v47  ;;  %v735_v58 = vld [vmem:[%s2393_s3] sm:$0xff]  ;;  %v1571_v62 = vpack.c.bf16 %v482_v55, %v476_v54  ;;  %v1579_v5 = vpack.c.bf16 %v738_v2, %v737_v1  ;;  %v740_v9 = vld [vmem:[%s2393_s3 + $0x28] sm:$0xff]  ;;  %v757_v10 = vld [vmem:[%s2393_s3 + $0xb0] sm:$0xff] }
  0x1f   : > { %1564 = vmatpush1.bf16.msra.mxu0 %v1563_v40  ;;  %726 = vmatprep.mubr.f32.mxu0 %v1771_v7  ;;  %v1575_v63 = vpack.c.bf16 %v736_v59, %v735_v58  ;;  %v755_v3 = vld [vmem:[%s2393_s3 + $0xa0] sm:$0xff]  ;;  %v758_v11 = vld [vmem:[%s2393_s3 + $0xb8] sm:$0xff]  ;;  %v741_v14 = vld [vmem:[%s2393_s3 + $0x30] sm:$0xff] }
  0x20   : > { %1566 = vmatprep.subr.bf16.mxu0 %v1565_v41  ;;  %v1581_v6 = vpack.c.bf16 %v756_v4, %v755_v3  ;;  %v739_v8 = vld [vmem:[%s2393_s3 + $0x20] sm:$0xff]  ;;  %v1585_v13 = vpack.c.bf16 %v758_v11, %v757_v10  ;;  %v742_v15 = vld [vmem:[%s2393_s3 + $0x38] sm:$0xff]  ;;  %v760_v18 = vld [vmem:[%s2393_s3 + $0xc8] sm:$0xff]  ;;  %v486_v41 = vlaneseq }
  0x21   : > { %1560 = vmatpush1.bf16.msra.mxu1 %v1559_v56  ;;  %v1583_v12 = vpack.c.bf16 %v740_v9, %v739_v8  ;;  %v1587_v16 = vpack.c.bf16 %v742_v15, %v741_v14  ;;  %v759_v17 = vld [vmem:[%s2393_s3 + $0xc0] sm:$0xff]  ;;  %v744_v21 = vld [vmem:[%s2393_s3 + $0x48] sm:$0xff]  ;;  %v761_v23 = vld [vmem:[%s2393_s3 + $0xd0] sm:$0xff] }
  0x22   : > { %1574 = vmatprep.subr.bf16.mxu1 %v1573_v57  ;;  %v1589_v19 = vpack.c.bf16 %v760_v18, %v759_v17  ;;  %v743_v20 = vld [vmem:[%s2393_s3 + $0x40] sm:$0xff]  ;;  %v762_v24 = vld [vmem:[%s2393_s3 + $0xd8] sm:$0xff]  ;;  %v745_v25 = vld [vmem:[%s2393_s3 + $0x50] sm:$0xff]  ;;  %v2123_v43 = vshrl.u32 %v486_v41, 7 }
  0x23   : > { %1568 = vmatpush1.bf16.msra.mxu0 %v1567_v52  ;;  %v1591_v22 = vpack.c.bf16 %v744_v21, %v743_v20  ;;  %v1593_v26 = vpack.c.bf16 %v762_v24, %v761_v23  ;;  %v746_v27 = vld [vmem:[%s2393_s3 + $0x58] sm:$0xff]  ;;  %v763_v28 = vld [vmem:[%s2393_s3 + $0xe0] sm:$0xff]  ;;  %v764_v29 = vld [vmem:[%s2393_s3 + $0xe8] sm:$0xff] }
  0x24   : > { %1570 = vmatprep.subr.bf16.mxu0 %v1569_v53  ;;  %1422 = vmatmul.mubr.msk.f32.vlgmr.msra.gmra.mrb[0].mxu1 %vm516_vm0, %v447_v39  ;;  %v1595_v30 = vpack.c.bf16 %v746_v27, %v745_v25  ;;  %v1597_v31 = vpack.c.bf16 %v764_v29, %v763_v28  ;;  %v747_v32 = vld [vmem:[%s2393_s3 + $0x60] sm:$0xff]  ;;  %v748_v33 = vld [vmem:[%s2393_s3 + $0x68] sm:$0xff]  ;;  %v765_v35 = vld [vmem:[%s2393_s3 + $0xf0] sm:$0xff]  ;;  %v488_v45 = vsub.s32 0, %v2123_v43  ;;  %v504_v46 = vsub.s32 4, %v2123_v43 }
  0x25   : > { %1576 = vmatpush3.bf16.msra.mxu1 %v1575_v63  ;;  %v1599_v34 = vpack.c.bf16 %v748_v33, %v747_v32  ;;  %v766_v36 = vld [vmem:[%s2393_s3 + $0xf8] sm:$0xff]  ;;  %v749_v38 = vld [vmem:[%s2393_s3 + $0x70] sm:$0xff]  ;;  %v2130_v47 = vld [vmem:[%s2392_s2] sm:$0x3f]  ;;  %v492_v48 = vsub.s32 1, %v2123_v43  ;;  %v508_v49 = vsub.s32 5, %v2123_v43 }
  0x26   : > { %1578 = vmatprep.subr.bf16.mxu1 %v1577_v0  ;;  %v1601_v37 = vpack.c.bf16 %v766_v36, %v765_v35  ;;  %v489_v50 = vrot.slane %v2130_v47, %v488_v45  ;;  %v505_v51 = vrot.slane %v2130_v47, %v504_v46  ;;  %v916_v35 = vld [vmem:[%s2394_s4 + $0x10] sm:$0xff] }
  0x27   : > { %1572 = vmatpush1.bf16.msra.mxu0 %v1571_v62  ;;  %v493_v53 = vrot.slane %v2130_v47, %v492_v48  ;;  %v509_v54 = vrot.slane %v2130_v47, %v508_v49  ;;  %v1004_v48 = vld [vmem:[%s2396_s6] sm:$0xff]  ;;  %v1005_v49 = vld [vmem:[%s2396_s6 + $0x8] sm:$0xff] }
  0x29   : > { %1580 = vmatpush3.bf16.msra.mxu1 %v1579_v5 }
  0x2a   : > { %1423 = vmatmul.mubr.msk.f32.vlgmr.msra.gmra.mrb[2].mxu0 %vm516_vm0, %v447_v39  ;;  %1582 = vmatprep.subr.bf16.mxu1 %v1581_v6  ;;  %v750_v39 = vld [vmem:[%s2393_s3 + $0x78] sm:$0xff] }
  0x2b   : > { %995 = vmatprep.mubr.f32.mxu0 %v1771_v7  ;;  %v1603_v40 = vpack.c.bf16 %v750_v39, %v749_v38  ;;  %v918_v38 = vld [vmem:[%s2394_s4 + $0x20] sm:$0xf] }
  0x2c   : > { %v1020_v39 = vld [vmem:[%s2396_s6 + $0x80] sm:$0xff] }
  0x2d   : > { %1584 = vmatpush3.bf16.msra.mxu1 %v1583_v12 }
  0x2e   : > { %1586 = vmatprep.subr.bf16.mxu1 %v1585_v13 }
  0x31   : > { %1588 = vmatpush3.bf16.msra.mxu1 %v1587_v16 }
  0x32   : > { %1590 = vmatprep.subr.bf16.mxu1 %v1589_v19 }
  0x35   : > { %1592 = vmatpush3.bf16.msra.mxu1 %v1591_v22 }
  0x36   : > { %1594 = vmatprep.subr.bf16.mxu1 %v1593_v26 }
  0x39   : > { %1596 = vmatpush3.bf16.msra.mxu1 %v1595_v30  ;;  %v915_v30 = vld [vmem:[%s2394_s4 + $0x8] sm:$0xff] }
  0x3a   : > { %1598 = vmatprep.subr.bf16.mxu1 %v1597_v31  ;;  %v917_v31 = vld [vmem:[%s2394_s4 + $0x18] sm:$0xff] }
  0x3b   : > { %v1605_v33 = vpack.c.bf16 %v917_v31, %v915_v30  ;;  %v1017_v30 = vld [vmem:[%s2396_s6 + $0x68] sm:$0xff] }
  0x3d   : > { %1600 = vmatpush3.bf16.msra.mxu1 %v1599_v34  ;;  %v914_v34 = vld [vmem:[%s2394_s4] sm:$0xff]  ;;  %1606 = vmatprep.subr.bf16.mxu0 %v1605_v33  ;;  %v1035_v33 = vld [vmem:[%s2396_s6 + $0xf8] sm:$0xff] }
  0x3e   : > { %1602 = vmatprep.subr.bf16.mxu1 %v1601_v37  ;;  %v1607_v36 = vpack.c.bf16 %v916_v35, %v914_v34  ;;  %v919_v37 = vld [vmem:[%s2394_s4 + $0x28] sm:$0xf]  ;;  %v1018_v35 = vld [vmem:[%s2396_s6 + $0x70] sm:$0xff] }
  0x40   : > { %1608 = vmatpush1.bf16.msra.mxu0 %v1607_v36  ;;  %v1019_v36 = vld [vmem:[%s2396_s6 + $0x78] sm:$0xff] }
  0x41   : > { %1604 = vmatpush3.bf16.msra.mxu1 %v1603_v40  ;;  %1424 = vmatprep.subr.msk.mxu0 %vm924_vm5, %v919_v37  ;;  %v1021_v40 = vld [vmem:[%s2396_s6 + $0x88] sm:$0xff]  ;;  %v1639_v37 = vpack.c.bf16 %v1019_v36, %v1018_v35 }
  0x42   : > { %v1609_v41 = vpack.c.bf16 %v1021_v40, %v1020_v39  ;;  %v500_v39 = vsub.s32 3, %v2123_v43 }
  0x44   : > { %1425 = vmatpush1.msk.msra.mxu0 %vm924_vm5, %v918_v38  ;;  %v496_v38 = vsub.s32 2, %v2123_v43  ;;  %v1115_v43 = vld [vmem:[%s2398_s8 + $0x8] sm:$0xff] }
  0x45   : > { %1610 = vmatprep.subr.bf16.mxu0 %v1609_v41  ;;  %v501_v41 = vrot.slane %v2130_v47, %v500_v39 }
  0x46   : > { %v497_v40 = vrot.slane %v2130_v47, %v496_v38  ;;  %v1116_v47 = vld [vmem:[%s2398_s8 + $0x10] sm:$0xff] }
  0xf1   : > { %v586_v42 = vpop.f32.mrb[0].mxu0 }
  0xf2   : > { %v588_v44 = vpop.f32.mrb[1].mxu0  ;;  %v587_v57 = vadd.f32 %v586_v42, %v489_v50 }
  0xf3   : > { %v589_v60 = vadd.f32 %v588_v44, %v493_v53 }
  0xf7   : > { %v2136_v52 = vpop.f32.mrb[0].mxu1 }
  0xf8   : > { %v2140_v55 = vpop.f32.mrb[1].mxu1 }
  0xfd   : > { %v728_v56 = vpop.f32.mrb[2].mxu0 }
  0xfe   : > { %v729_v58 = vadd.f32 %v728_v56, %v505_v51  ;;  %v730_v59 = vpop.f32.mrb[3].mxu0  ;;  %v1023_v56 = vld [vmem:[%s2396_s6 + $0x98] sm:$0xff] }
  0xff   : > { %v731_v61 = vadd.f32 %v730_v59, %v509_v54  ;;  %v1022_v54 = vld [vmem:[%s2396_s6 + $0x90] sm:$0xff]  ;;  %v1611_v59 = vpack.c.bf16 %v1005_v49, %v1004_v48 }
 0x100   : > { %v733_v62 = vmul.f32 %v729_v58, %v587_v57 }
 0x101   : > { %v734_v63 = vmul.f32 %v731_v61, %v589_v60  ;;  %v1613_v61 = vpack.c.bf16 %v1023_v56, %v1022_v54  ;;  %v1427_v56 = vld [vmem:[%s2397_s7] ss:$0 sm:$0xff] }
 0x103   : > { %831 = vmatprep.mubr.f32.mxu1 %v734_v63  ;;  %v1007_v63 = vld [vmem:[%s2396_s6 + $0x18] sm:$0xff] }
 0x104   : > { %832 = vmatmul.mubr.f32.vlgmr.msra.gmra.mrb[2].mxu1 %v733_v62  ;;  %v1006_v62 = vld [vmem:[%s2396_s6 + $0x10] sm:$0xff] }
 0x105   : > { %1525 = vmatprep.mubr.msk.f32.mxu1 %vm1781_vm7, %v1771_v7 }
 0x1d7   : > { %v1470_v0 = vpop.f32.mrb[2].mxu1 }
 0x1d8   : > { %v1471_v1 = vpop.f32.mrb[3].mxu1 }
 0x1d9   : > { %v1472_v2 = vadd.f32 %v1471_v1, %v1470_v0  ;;  %v1024_v0 = vld [vmem:[%s2396_s6 + $0xa0] sm:$0xff]  ;;  %v1025_v1 = vld [vmem:[%s2396_s6 + $0xa8] sm:$0xff] }
 0x1db   : > { %846 = vrot.lane.b32.xlu1 %v1472_v2, %s1772_s27  ;;  %838 = vrot.lane.b32.xlu0 %v1472_v2, %s1773_s17 }
 0x1df   : > { %850 = vrot.lane.b32.xlu1 %v1472_v2, %s1774_s16  ;;  %842 = vrot.lane.b32.xlu0 %v1472_v2, %s1775_s30 }
 0x24d   : > { %v839_v3 = vpop.permute.xlu0 %838  ;;  %v847_v4 = vpop.permute.xlu1 %846 }
 0x24e   : > { %v841_v5 = vmax.f32 %v1472_v2, %v839_v3  ;;  %v1617_v3 = vpack.c.bf16 %v1025_v1, %v1024_v0 }
 0x251   : > { %v843_v6 = vpop.permute.xlu0 %842  ;;  %v851_v10 = vpop.permute.xlu1 %850 }
 0x252   : > { %v845_v8 = vmax.f32 %v841_v5, %v843_v6  ;;  %v1009_v5 = vld [vmem:[%s2396_s6 + $0x28] sm:$0xff]  ;;  %v1026_v6 = vld [vmem:[%s2396_s6 + $0xb0] sm:$0xff] }
 0x254   : > { %v849_v9 = vmax.f32 %v845_v8, %v847_v4  ;;  %v1008_v4 = vld [vmem:[%s2396_s6 + $0x20] sm:$0xff]  ;;  %v1027_v8 = vld [vmem:[%s2396_s6 + $0xb8] sm:$0xff] }
 0x256   : > { %v853_v11 = vmax.f32 %v849_v9, %v851_v10  ;;  %v1619_v9 = vpack.c.bf16 %v1009_v5, %v1008_v4  ;;  %v1621_v10 = vpack.c.bf16 %v1027_v8, %v1026_v6 }
 0x258   : > { %858 = vrot.lane.b32.xlu1 %v853_v11, %s1776_s14  ;;  %855 = vrot.lane.b32.xlu0 %v853_v11, %s1777_s19 }
 0x25c   : > { %864 = vrot.lane.b32.xlu1 %v853_v11, %s1778_s25  ;;  %861 = vrot.lane.b32.xlu0 %v853_v11, %s1779_s20 }
 0x2ca   : > { %v859_v12 = vpop.permute.xlu1 %858  ;;  %v856_v13 = vpop.permute.xlu0 %855 }
 0x2cb   : > { %v868_v14 = vsel %vm867_vm1, %v853_v11, %v856_v13  ;;  %v1010_v11 = vld [vmem:[%s2396_s6 + $0x30] sm:$0xff]  ;;  %v1028_v13 = vld [vmem:[%s2396_s6 + $0xc0] sm:$0xff] }
 0x2cc   : > { %v870_v16 = vsel %vm869_vm2, %v868_v14, %v859_v12  ;;  %v1011_v12 = vld [vmem:[%s2396_s6 + $0x38] sm:$0xff]  ;;  %v1029_v14 = vld [vmem:[%s2396_s6 + $0xc8] sm:$0xff] }
 0x2ce   : > { %v865_v15 = vpop.permute.xlu1 %864  ;;  %v862_v17 = vpop.permute.xlu0 %861 }
 0x2cf   : > { %v872_v18 = vsel %vm871_vm3, %v870_v16, %v862_v17  ;;  %v1625_v16 = vpack.c.bf16 %v1029_v14, %v1028_v13  ;;  %v1012_v17 = vld [vmem:[%s2396_s6 + $0x40] sm:$0xff] }
 0x2d0   : > { %v874_v19 = vsel %vm873_vm4, %v872_v18, %v865_v15  ;;  %v1623_v15 = vpack.c.bf16 %v1011_v12, %v1010_v11  ;;  %v1013_v18 = vld [vmem:[%s2396_s6 + $0x48] sm:$0xff] }
 0x2d1   : > { %v875_v20 = vsub.f32 %v1472_v2, %v874_v19  ;;  %v1615_v2 = vpack.c.bf16 %v1007_v63, %v1006_v62  ;;  %v1030_v19 = vld [vmem:[%s2396_s6 + $0xd0] sm:$0xff]  ;;  %v1233_v62 = vld [vmem:[%s2395_s5] sm:$0xff]  ;;  %v1234_v63 = vld [vmem:[%s2395_s5 + $0x8] sm:$0xff] }
 0x2d2   : > { %v1648_v0 = vpack.c.bf16 %v1234_v63, %v1233_v62 }
 0x2d3   : > { %v876_v21 = vmul.f32 1.442695, %v875_v20  ;;  %v1031_v20 = vld [vmem:[%s2396_s6 + $0xd8] sm:$0xff] }
 0x2d5   : > { %1701 = vpow2.f32 %v876_v21  ;;  %v1627_v21 = vpack.c.bf16 %v1013_v18, %v1012_v17 }
 0x2df   : > { %v1702_v22 = vpop.eup %1701 }
 0x2e0   : > { %883 = vrot.lane.b32.xlu1 %v1702_v22, %s1775_s30  ;;  %879 = vrot.lane.b32.xlu0 %v1702_v22, %s1773_s17 }
 0x2e4   : > { %891 = vrot.lane.b32.xlu1 %v1702_v22, %s1774_s16  ;;  %887 = vrot.lane.b32.xlu0 %v1702_v22, %s1772_s27  ;;  %s1782_s27 = smov 96  }
 0x352   : > { %v884_v23 = vpop.permute.xlu1 %883  ;;  %v880_v24 = vpop.permute.xlu0 %879 }
 0x353   : > { %v882_v25 = vadd.f32 %v1702_v22, %v880_v24  ;;  %v1015_v24 = vld [vmem:[%s2396_s6 + $0x58] sm:$0xff] }
 0x355   : > { %v886_v26 = vadd.f32 %v884_v23, %v882_v25  ;;  %v1014_v23 = vld [vmem:[%s2396_s6 + $0x50] sm:$0xff]  ;;  %v1032_v25 = vld [vmem:[%s2396_s6 + $0xe0] sm:$0xff] }
 0x356   : > { %v888_v27 = vpop.permute.xlu0 %887  ;;  %v892_v29 = vpop.permute.xlu1 %891 }
 0x357   : > { %v890_v28 = vadd.f32 %v888_v27, %v886_v26  ;;  %v1033_v26 = vld [vmem:[%s2396_s6 + $0xe8] sm:$0xff]  ;;  %v1631_v27 = vpack.c.bf16 %v1015_v24, %v1014_v23 }
 0x359   : > { %v894_v32 = vadd.f32 %v892_v29, %v890_v28  ;;  %v1633_v28 = vpack.c.bf16 %v1033_v26, %v1032_v25  ;;  %v1016_v29 = vld [vmem:[%s2396_s6 + $0x60] sm:$0xff] }
 0x35a   : > { %v1635_v31 = vpack.c.bf16 %v1017_v30, %v1016_v29 }
 0x35b   : > { %1703 = vrcp.f32 %v894_v32  ;;  %v1034_v32 = vld [vmem:[%s2396_s6 + $0xf0] sm:$0xff] }
 0x35c   : > { %v1637_v34 = vpack.c.bf16 %v1035_v33, %v1034_v32 }
 0x365   : > { %v1704_v42 = vpop.eup %1703 }
 0x366   : > { %900 = vrot.lane.b32.xlu1 %v1704_v42, %s1776_s14  ;;  %897 = vrot.lane.b32.xlu0 %v1704_v42, %s1777_s19  ;;  %s1435_s14 = sshll.u32 %s1875_s29, 7  ;;  %s1783_s29 = smov [#allocation2]  }
 0x367   : > { %s2347_s16 = scalar_lea.hbm %s2402_s12, %s1435_s14 }
 0x36a   : > { %906 = vrot.lane.b32.xlu1 %v1704_v42, %s1778_s25  ;;  %903 = vrot.lane.b32.xlu0 %v1704_v42, %s1779_s20  ;;  %s2417_s20 = sshll.u32 %s1933_s15, 3  ;;  %s430_s15 = sand.u32 1, %s1761_s26  }
 0x36b   : > { %s1418_s30 = sshll.u32 %s430_s15, 3 }
 0x36c   : > { %s432_s19 = scalar_lea.vmem [#allocation2], %s1418_s30  ;;  %s1711_s30 = sshll.u32 %s1783_s29, 4  ;;  %s1712_s30 = int_to_ptr.vmem [resolvable:$false] %s1711_s30 }
 0x36d   : > { %s1328_s25 = sshll.u32 %s432_s19, 4  ;;  %s1713_s22 = scalar_lea.vmem %s1712_s30, 256  ;;  %s2349_s25 = int_to_ptr.vmem [resolvable:$true] %s1328_s25 }
 0x36e   : > { %s1707_s21 = scalar_lea.vmem %s2349_s25, 128  ;;  %p1714_p0 = scmp.lt.s32.totalorder %s2349_s25, %s1712_s30 }
 0x36f   : > { %p1708_p11 = scmp.ne.s32.totalorder %s2349_s25, %s1707_s21  ;;  %p1715_p1 = scmp.lt.s32.totalorder %s1713_s22, %s1707_s21 }
 0x371   : > { %p1709_p12 = pnand %p1708_p11, %p1892_p5  ;;  %p1716_p2 = por %p1715_p1, %p1714_p0 }
 0x373   : > { %p1710_p13 = pneg %p1709_p12 }
 0x375   : > { %p1717_p3 = pnand %p1716_p2, %p1710_p13 }
 0x3d8   : > { %v901_v44 = vpop.permute.xlu1 %900  ;;  %v898_v45 = vpop.permute.xlu0 %897 }
 0x3d9   : > { %v909_v46 = vsel %vm867_vm1, %v1704_v42, %v898_v45  ;;  %v658_v42 = vadd.f32 %v2136_v52, %v497_v40  ;;  %v1780_v52 = vmov 0.0|0.0  }
 0x3da   : > { %v910_v51 = vsel %vm869_vm2, %v909_v46, %v901_v44  ;;  %v660_v44 = vadd.f32 %v2140_v55, %v501_v41  ;;  %1641 = vmatprep.subr.bf16.mxu1 %v1780_v52 }
 0x3dc   : > { %v907_v50 = vpop.permute.xlu1 %906  ;;  %v904_v53 = vpop.permute.xlu0 %903 }
 0x3dd   : > { %v911_v57 = vsel %vm871_vm3, %v910_v51, %v904_v53  ;;  %v1117_v51 = vld [vmem:[%s2398_s8 + $0x18] sm:$0xff] }
 0x3de   : > { %v912_v58 = vsel %vm873_vm4, %v911_v57, %v907_v50  ;;  %v1114_v50 = vld [vmem:[%s2398_s8] sm:$0xff]  ;;  %v1645_v53 = vpack.c.bf16 %v1117_v51, %v1116_v47 }
 0x3df   : > { %v2204_v60 = vmul.f32 %v1702_v22, %v912_v58  ;;  %v1629_v22 = vpack.c.bf16 %v1031_v20, %v1030_v19  ;;  %v1642_v55 = vpack.c.bf16 %v1115_v43, %v1114_v50  ;;  %v1430_v19 = vld [vmem:[%s2400_s10] ss:$0 sm:$0xff] }
 0x3e1   : > { %1426 = vmatmul.mubr.msk.f32.vlgmr.msra.gmra.mrb[4].mxu0 %vm920_vm6, %v2204_v60  ;;  %1643 = vmatpush3.bf16.msra.mxu1 %v1642_v55 }
 0x3e2   : > { %1612 = vmatpush3.bf16.msra.mxu0 %v1611_v59  ;;  %1644 = vmatprep.subr.bf16.mxu1 %v1780_v52 }
 0x3e3   : > { %1614 = vmatprep.subr.bf16.mxu0 %v1613_v61 }
 0x3e5   : > { %1646 = vmatpush3.bf16.msra.mxu1 %v1645_v53 }
 0x3e6   : > { %1616 = vmatpush3.bf16.msra.mxu0 %v1615_v2  ;;  %1647 = vmatprep.subr.bf16.mxu1 %v1780_v52  ;;  %v1235_v2 = vld [vmem:[%s2395_s5 + $0x10] sm:$0xf] }
 0x3e7   : > { %1618 = vmatprep.subr.bf16.mxu0 %v1617_v3  ;;  %v1428_v3 = vld [vmem:[%s2399_s9] ss:$0 sm:$0xff] }
 0x3ea   : > { %1620 = vmatpush3.bf16.msra.mxu0 %v1619_v9 }
 0x3eb   : > { %1622 = vmatprep.subr.bf16.mxu0 %v1621_v10 }
 0x3ee   : > { %1624 = vmatpush3.bf16.msra.mxu0 %v1623_v15 }
 0x3ef   : > { %1626 = vmatprep.subr.bf16.mxu0 %v1625_v16 }
 0x3f2   : > { %1628 = vmatpush3.bf16.msra.mxu0 %v1627_v21  ;;  %v1431_v21 = vld [vmem:[%s2401_s11] ss:$0 sm:$0xff] }
 0x3f3   : > { %1630 = vmatprep.subr.bf16.mxu0 %v1629_v22 }
 0x3f6   : > { %1632 = vmatpush3.bf16.msra.mxu0 %v1631_v27 }
 0x3f7   : > { %1634 = vmatprep.subr.bf16.mxu0 %v1633_v28 }
 0x3fa   : > { %1636 = vmatpush3.bf16.msra.mxu0 %v1635_v31 }
 0x3fb   : > { %1638 = vmatprep.subr.bf16.mxu0 %v1637_v34 }
 0x3fe   : > { %1640 = vmatpush3.bf16.msra.mxu0 %v1639_v37 }
 0x4b4   : > { %v997_v45 = vpop.f32.mrb[4].mxu0 }
 0x4b5   : > { %v1002_v46 = vmul.f32 %v997_v45, %v658_v42  ;;  %v999_v48 = vpop.f32.mrb[5].mxu0 }
 0x4b6   : > { %v1003_v49 = vmul.f32 %v999_v48, %v660_v44 }
 0x4b8   : > { %1107 = vmatprep.mubr.f32.mxu0 %v1003_v49 }
 0x4b9   : > { %1108 = vmatmul.mubr.f32.vlgmr.msra.gmra.mrb[6].mxu0 %v1002_v46 }
 0x58c   : > { %v1505_v54 = vpop.f32.mrb[6].mxu0 }
 0x58d   : > { %v1506_v57 = vpop.f32.mrb[7].mxu0 }
 0x58e   : > { %v1507_v58 = vadd.f32 %v1506_v57, %v1505_v54 }
 0x590   : > { %v1110_v59 = vadd.f32 %v1507_v58, %v1427_v56 }
 0x592   : > { %v1113_v61 = vmax.f32 %v1110_v59, 0.0 }
 0x594   : > { %1126 = vrot.lane.b32.xlu0 %v1113_v61, %s1782_s27  ;;  %s446_s27 = scalar_lea.vmem %s2403_s13, %s2417_s20 }
 0x606   : > { %v1127_v1 = vpop.permute.xlu0 %1126 }
 0x607   : > { %1526 = vmatmul.mubr.msk.f32.vlgmr.msra.gmra.mrb[4].mxu1 %vm1128_vm8, %v1127_v1 }
 0x608   : > { %1649 = vmatpush3.bf16.msra.mxu1 %v1648_v0  ;;  %1534 = vmatprep.mubr.msk.f32.mxu1 %vm1781_vm7, %v1771_v7 }
 0x609   : > { %1532 = vmatprep.subr.mxu1 %v1771_v7 }
 0x60c   : > { %1533 = vmatpush3.msk.msra.mxu1 %vm924_vm5, %v1235_v2 }
 0x60d   : > { %1535 = vmatmul.mubr.msk.f32.vlgmr.msra.gmra.mrb[6].mxu1 %vm920_vm6, %v2204_v60 }
 0x6da   : > { %v1197_v4 = vpop.f32.mrb[4].mxu1 }
 0x6db   : > { %v1198_v5 = vadd.f32 %v1428_v3, %v1197_v4  ;;  %v1527_v6 = vpop.f32.mrb[5].mxu1 }
 0x6dd   : > { %v1201_v8 = vadd.f32 %v1198_v5, %v1110_v59 }
 0x6df   : > { %v1202_v7 = vsel %vm1128_vm8, %v1201_v8, 0.0 }
 0x6e0   : > { %v1305_v9 = vpop.f32.mrb[6].mxu1  ;;  %1203 = vadd.xlane.f32.xlu1 %v1202_v7 }
 0x6e1   : > { %1309 = vst.msk [vmem:[%s446_s27] sm:$0xff] %vm867_vm1, %v1305_v9  ;;  %v1536_v60 = vpop.f32.mrb[7].mxu1  ;;  %s1311_s27 = scalar_lea.sflag [#allocation3], %s430_s15 }
 0x76d   : > { %v1204_v10 = vpop.xlane.xlu1 %1203 }
 0x76e   : > { %v1206_v11 = vmul.f32 0.03125, %v1204_v10 }
 0x770   : > { %v1207_v12 = vsub.f32 %v1201_v8, %v1206_v11 }
 0x772   : > { %v1208_v13 = vmul.f32 %v1207_v12, %v1207_v12 }
 0x774   : > { %v1209_v14 = vsel %vm1128_vm8, %v1208_v13, 0.0 }
 0x775   : > { %1210 = vadd.xlane.f32.xlu0 %v1209_v14 }
 0x802   : > { %v1211_v15 = vpop.xlane.xlu0 %1210 }
 0x803   : > { %v1212_v16 = vmul.f32 0.03125, %v1211_v15 }
 0x805   : > { %v1213_v17 = vadd.f32 1e-05, %v1212_v16 }
 0x807   : > { %1705 = vrsqrt.f32 %v1213_v17 }
 0x811   : > { %v1706_v18 = vpop.eup %1705 }
 0x812   : > { %v1215_v20 = vmul.f32 %v1706_v18, %v1207_v12 }
 0x814   : > { %v1223_v22 = vmul.f32 %v1430_v19, %v1215_v20 }
 0x816   : > { %v1231_v23 = vadd.f32 %v1431_v21, %v1223_v22 }
 0x818   : > { %1232 = vst.msk [vmem:[%s432_s19] sm:$0xff] %vm1128_vm8, %v1231_v23 }
 0x819   : > { %1720 = shalt.err (!%p1717_p3)
}
 0x81a   : > { %s1721_s15 = scalar_lea.hbm %s2347_s16, 128  ;;  %s1725_s14 = scalar_lea.hbm %s2402_s12, 256 }
 0x81b   : > { %p1722_p4 = scmp.ne.s32.totalorder %s2347_s16, %s1721_s15  ;;  %p1726_p9 = scmp.lt.u32.totalorder %s2347_s16, %s2402_s12 }
 0x81c   : > { %p1727_p10 = scmp.lt.u32.totalorder %s1725_s14, %s1721_s15  ;;  %p1729_p12 = scmp.lt.u32.totalorder %s1721_s15, %s2347_s16 }
 0x81d   : > { %p1723_p7 = pnand %p1722_p4, %p1892_p5 }
 0x81e   : > { %p1728_p11 = por %p1727_p10, %p1726_p9 }
 0x81f   : > { %p1724_p8 = pneg %p1723_p7 }
 0x820   : > { %p1730_p13 = por %p1729_p12, %p1728_p11 }
 0x822   : > { %p1731_p0 = pnand %p1730_p13, %p1724_p8 }
 0x824   : > { %1734 = shalt.err (!%p1731_p0)
}
 0x825   : > { %1650 = dma.vmem_to_hbm [thread:$0]  (%p1892_p5), %s2349_s25, 128, %s2347_s16, %s1311_s27  }
 0x826 PF: > { %s2418_s17 = sld [smem:[#allocation5_spill]]  ;;  %p1656_p1 = scmp.ge.s32.totalorder %s1769_s28, 2 }
 0x828   : > { %p1653_p2 = pnand %p1656_p1, %p1896_p6 }
 0x82c   : > { %s1343_s29 = sand.u32 1, %s2418_s17  }
 0x82d   : > { %s1344_s30 = scalar_lea.sflag [#allocation3], %s1343_s29 }
 0x82e   : > { %1752 = dma.done.wait (!%p1653_p2), %s1344_s30, 128  }
 0x82f   : > { %1754 = vsyncadd (!%p1653_p2), %s1344_s30, 4294967168  ;;  %s2420_s28 = sld [smem:[#allocation7_spill]]  ;;  %s2421_s22 = sld [smem:[#allocation6_spill]] }
 0x830   : > { %s2422_s27 = sld [smem:[#allocation8_spill]]  ;;  %s2423_s25 = smov %s1761_s26 }
 0x835   : > { %p24_p3 = scmp.ge.s32.totalorder %s2420_s28, 4   ;;  %s2424_s26 = smov %s2421_s22 }
 0x837   :  { %26 = sbr.rel (!%p24_p3) target bundleno = 3 (0x3), region = 115 }
 0x83e   :  { %1356 = vsyncpa [#allocation3], 1 }
 0x83f   :  { %1358 = vsyncpa [#allocation3 + $0x1], 1 }

</bundles_post_ra>
